<compile_context>
chip_gen: v7x
topology: tpu7x:2x2x1
jax: 0.10.0
libtpu: 0.0.40
codegen_flags: <defaults>
</compile_context>

<pallas_src>
import functools

import jax
import jax.numpy as jnp
from jax.experimental import pallas as pl

# Problem sizes (small, consistent with the module's forward).
B, CIN, H, W = 2, 4, 16, 16
COUT = 8
KSZ = 3
PAD = 1
NUM_CLASSES = 10
KDIM = KSZ * KSZ * CIN     # 36  (im2col contraction dim)
M = B * H * W              # 512 (im2col row count, whole batch)


# ------------------------- fused encoder+head kernel -------------------------
def _emb_kernel(p_ref, wc_ref, bc_ref, out_ref):
    # p_ref:  (M, KDIM) im2col patches for the whole batch
    # wc_ref: (KDIM, COUT) flattened conv weights
    # bc_ref: (1, COUT) conv bias
    # out_ref:(B, COUT) pooled embedding
    feat = jnp.dot(p_ref[...], wc_ref[...], preferred_element_type=jnp.float32)
    feat = jnp.maximum(feat + bc_ref[0, :], 0.0)              # bias + ReLU, (M, COUT)
    out_ref[...] = jnp.mean(feat.reshape(B, H * W, COUT), axis=1)


def _logits_kernel(p_ref, wc_ref, bc_ref, wh_ref, bh_ref, out_ref):
    # Same as above, plus head Linear(8 -> 10); only logits leave VMEM.
    feat = jnp.dot(p_ref[...], wc_ref[...], preferred_element_type=jnp.float32)
    feat = jnp.maximum(feat + bc_ref[0, :], 0.0)              # (M, COUT)
    emb = jnp.mean(feat.reshape(B, H * W, COUT), axis=1)      # (B, COUT)
    out_ref[...] = (jnp.dot(emb, wh_ref[...], preferred_element_type=jnp.float32)
                    + bh_ref[0, :])


def _im2col(x_nhwc):
    # (B, H, W, CIN) -> (B*H*W, 9*CIN) patch slab, ordered (kh, kw, cin) to
    # match w_conv.reshape(KDIM, COUT).  Fused into one XLA copy under jit.
    xp = jnp.pad(x_nhwc, ((0, 0), (PAD, PAD), (PAD, PAD), (0, 0)))
    cols = [xp[:, kh:kh + H, kw:kw + W, :]
            for kh in range(KSZ) for kw in range(KSZ)]
    return jnp.concatenate(cols, axis=-1).reshape(M, KDIM)


# ------------------------- BaseModel.forward equivalent -------------------------
@functools.partial(jax.jit, static_argnames=("emb",))
def base_model_forward(x_nchw, params, emb: bool = False):
    w_conv, b_conv, w_head, b_head = params
    x_nhwc = jnp.transpose(x_nchw, (0, 2, 3, 1))              # NCHW -> NHWC
    patches = _im2col(x_nhwc)                                 # (512, 36)
    w_flat = w_conv.reshape(KDIM, COUT)                       # (36, 8)

    if emb:
        return pl.pallas_call(
            _emb_kernel,
            out_shape=jax.ShapeDtypeStruct((B, COUT), jnp.float32),
        )(patches, w_flat, b_conv)
    return pl.pallas_call(
        _logits_kernel,
        out_shape=jax.ShapeDtypeStruct((B, NUM_CLASSES), jnp.float32),
    )(patches, w_flat, b_conv, w_head, b_head)


def _reference_forward(x_nchw, params, emb: bool = False):
    # pure-JAX reference for a sanity check
    w_conv, b_conv, w_head, b_head = params
    x_nhwc = jnp.transpose(x_nchw, (0, 2, 3, 1))
    y = jax.lax.conv_general_dilated(
        x_nhwc, w_conv, window_strides=(1, 1), padding="SAME",
        dimension_numbers=("NHWC", "HWIO", "NHWC"))
    y = jnp.maximum(y + b_conv[0], 0.0)
    e = jnp.mean(y, axis=(1, 2))
    logits = e @ w_head + b_head[0]
    return e if emb else logits


if __name__ == "__main__":
    key = jax.random.PRNGKey(0)
    k_x, k_wc, k_bc, k_wh, k_bh = jax.random.split(key, 5)

    # Deterministic synthetic parameters (shapes implied by the module instantiation).
    x = jax.random.normal(k_x, (B, CIN, H, W), jnp.float32)                 # NCHW input
    w_conv = jax.random.normal(k_wc, (KSZ, KSZ, CIN, COUT), jnp.float32) * 0.1
    b_conv = jax.random.normal(k_bc, (1, COUT), jnp.float32) * 0.1
    w_head = jax.random.normal(k_wh, (COUT, NUM_CLASSES), jnp.float32) * 0.1
    b_head = jax.random.normal(k_bh, (1, NUM_CLASSES), jnp.float32) * 0.1
    params = (w_conv, b_conv, w_head, b_head)

    logits = jax.block_until_ready(base_model_forward(x, params, emb=False))
    embedding = jax.block_until_ready(base_model_forward(x, params, emb=True))

    ref_logits = _reference_forward(x, params, emb=False)
    ref_emb = _reference_forward(x, params, emb=True)
    assert logits.shape == (B, NUM_CLASSES) and embedding.shape == (B, COUT)
    assert jnp.allclose(logits, ref_logits, atol=1e-4, rtol=1e-4)
    assert jnp.allclose(embedding, ref_emb, atol=1e-4, rtol=1e-4)

    print("KERNEL_OK")
</pallas_src>

<mosaic_0001>
module attributes {stable_mosaic.version = 11 : i64} {
  func.func @_logits_kernel(%arg0: memref<512x36xf32, #tpu.memory_space<vmem>>, %arg1: memref<36x8xf32, #tpu.memory_space<vmem>>, %arg2: memref<1x8xf32, #tpu.memory_space<vmem>>, %arg3: memref<8x10xf32, #tpu.memory_space<vmem>>, %arg4: memref<1x10xf32, #tpu.memory_space<vmem>>, %arg5: memref<2x10xf32, #tpu.memory_space<vmem>>) attributes {dimension_semantics = [], scalar_prefetch = 0 : i64, scratch_operands = 0 : i64, tpu.core_type = #tpu.core_type<tc>} {
    %c0 = arith.constant 0 : index
    %c0_0 = arith.constant 0 : index
    %0 = vector.load %arg0[%c0, %c0_0] : memref<512x36xf32, #tpu.memory_space<vmem>>, vector<512x36xf32>
    %c0_1 = arith.constant 0 : index
    %c0_2 = arith.constant 0 : index
    %1 = vector.load %arg1[%c0_1, %c0_2] : memref<36x8xf32, #tpu.memory_space<vmem>>, vector<36x8xf32>
    %cst = arith.constant dense<0.000000e+00> : vector<512x8xf32>
    %2 = tpu.matmul %0, %1, %cst {dimension_numbers = #tpu.dot_dimension_numbers<[1], [0], [0], [1], [0, 0, 1, 1], [], []>} : vector<512x36xf32>, vector<36x8xf32>, vector<512x8xf32> -> vector<512x8xf32>
    %c0_3 = arith.constant 0 : index
    %c0_4 = arith.constant 0 : index
    %3 = vector.load %arg2[%c0_3, %c0_4] : memref<1x8xf32, #tpu.memory_space<vmem>>, vector<1x8xf32>
    %4 = vector.shape_cast %3 : vector<1x8xf32> to vector<8xf32>
    %5 = vector.shape_cast %4 : vector<8xf32> to vector<1x8xf32>
    %6 = vector.broadcast %5 : vector<1x8xf32> to vector<512x8xf32>
    %7 = arith.addf %2, %6 : vector<512x8xf32>
    %cst_5 = arith.constant 0.000000e+00 : f32
    %8 = vector.broadcast %cst_5 : f32 to vector<512x8xf32>
    %9 = arith.maximumf %7, %8 : vector<512x8xf32>
    %10 = vector.shape_cast %9 : vector<512x8xf32> to vector<2x256x8xf32>
    %cst_6 = arith.constant dense<0.000000e+00> : vector<2x8xf32>
    %11 = vector.multi_reduction <add>, %10, %cst_6 [1] : vector<2x256x8xf32> to vector<2x8xf32>
    %cst_7 = arith.constant 2.560000e+02 : f32
    %12 = vector.broadcast %cst_7 : f32 to vector<2x8xf32>
    %13 = arith.divf %11, %12 : vector<2x8xf32>
    %c0_8 = arith.constant 0 : index
    %c0_9 = arith.constant 0 : index
    %14 = vector.load %arg3[%c0_8, %c0_9] : memref<8x10xf32, #tpu.memory_space<vmem>>, vector<8x10xf32>
    %cst_10 = arith.constant dense<0.000000e+00> : vector<2x10xf32>
    %15 = tpu.matmul %13, %14, %cst_10 {dimension_numbers = #tpu.dot_dimension_numbers<[1], [0], [0], [1], [0, 0, 1, 1], [], []>} : vector<2x8xf32>, vector<8x10xf32>, vector<2x10xf32> -> vector<2x10xf32>
    %c0_11 = arith.constant 0 : index
    %c0_12 = arith.constant 0 : index
    %16 = vector.load %arg4[%c0_11, %c0_12] : memref<1x10xf32, #tpu.memory_space<vmem>>, vector<1x10xf32>
    %17 = vector.shape_cast %16 : vector<1x10xf32> to vector<10xf32>
    %18 = vector.shape_cast %17 : vector<10xf32> to vector<1x10xf32>
    %19 = vector.broadcast %18 : vector<1x10xf32> to vector<2x10xf32>
    %20 = arith.addf %15, %19 : vector<2x10xf32>
    %c0_13 = arith.constant 0 : index
    %c0_14 = arith.constant 0 : index
    %21 = vector.load %arg5[%c0_13, %c0_14] : memref<2x10xf32, #tpu.memory_space<vmem>>, vector<2x10xf32>
    tpu.vector_store %arg5[%c0_13, %c0_14], %20 {strides = array<i32>} : memref<2x10xf32, #tpu.memory_space<vmem>>, vector<2x10xf32>,
    return
  }
}

</mosaic_0001>

<bundles_post_ra>
// kernel: base_model_forward.1
= control target key start
LH: loop header
LB: loop body
LE: loop exit
PB: predicated region body
PF: predicated region fallthrough
CT: control target
= control target key end

     0   :  { %vm97_vm0 = vcmask 293888   ;;  %vm290_vm1 = vcmask 1043456   ;;  %s1826_s0 = inlined_call_operand.vmem [shape: f32[512,36], index: 0, kind: input, shape index: {}]   ;;  %s1827_s1 = inlined_call_operand.vmem [shape: f32[36,8], index: 1, kind: input, shape index: {}]   ;;  %s1828_s2 = inlined_call_operand.vmem [shape: f32[1,8], index: 2, kind: input, shape index: {}]   ;;  %s1829_s3 = inlined_call_operand.vmem [shape: f32[8,10], index: 3, kind: input, shape index: {}]   ;;  %s1830_s4 = inlined_call_operand.vmem [shape: f32[1,10], index: 4, kind: input, shape index: {}]   ;;  %s1831_s5 = inlined_call_operand.hbm [shape: f32[2,10], index: 5, kind: output, shape index: {}]  }
   0x1   :  { %v85_v0 = vld [vmem:[%s1827_s1] sm:$0xff]  ;;  %v86_v1 = vld [vmem:[%s1827_s1 + $0x8] sm:$0xff]  ;;  %v87_v2 = vld [vmem:[%s1827_s1 + $0x10] sm:$0xff] }
   0x2   :  { %v1235_v3 = vpack.c.bf16 %v86_v1, %v85_v0  ;;  %v88_v4 = vld [vmem:[%s1827_s1 + $0x18] sm:$0xff]  ;;  %v21_v5 = vld [vmem:[%s1826_s0] sm:$0xff]  ;;  %v22_v8 = vld [vmem:[%s1826_s0 + $0x8] sm:$0xff] }
   0x3   :  { %v1239_v6 = vpack.c.bf16 %v88_v4, %v87_v2  ;;  %1134 = vmatprep.mubr.msk.f32.mxu0 %vm97_vm0, %v21_v5  ;;  %v89_v7 = vld [vmem:[%s1827_s1 + $0x20] sm:$0xf]  ;;  %v23_v9 = vld [vmem:[%s1826_s0 + $0x10] sm:$0xff]  ;;  %v56_v11 = vld [vmem:[%s1826_s0 + $0x118] sm:$0xff] }
   0x4   :  { %1236 = vmatprep.subr.bf16.mxu0 %v1235_v3  ;;  %1243 = vmatprep.subr.bf16.mxu1 %v1235_v3  ;;  %v55_v10 = vld [vmem:[%s1826_s0 + $0x110] sm:$0xff]  ;;  %v57_v12 = vld [vmem:[%s1826_s0 + $0x120] sm:$0xff]  ;;  %v24_v13 = vld [vmem:[%s1826_s0 + $0x18] sm:$0xff] }
   0x5   :  { %1238 = vmatpush3.bf16.msra.mxu0 %v1235_v3  ;;  %1246 = vmatpush3.bf16.msra.mxu1 %v1235_v3  ;;  %v25_v14 = vld [vmem:[%s1826_s0 + $0x20] sm:$0xff]  ;;  %v58_v15 = vld [vmem:[%s1826_s0 + $0x128] sm:$0xff]  ;;  %v59_v16 = vld [vmem:[%s1826_s0 + $0x130] sm:$0xff] }
   0x6   :  { %1240 = vmatprep.subr.bf16.mxu0 %v1239_v6  ;;  %1244 = vmatprep.subr.bf16.mxu1 %v1239_v6  ;;  %v26_v17 = vld [vmem:[%s1826_s0 + $0x28] sm:$0xff]  ;;  %v27_v18 = vld [vmem:[%s1826_s0 + $0x30] sm:$0xff]  ;;  %v60_v19 = vld [vmem:[%s1826_s0 + $0x138] sm:$0xff] }
   0x7   :  { %1185 = vmatprep.mubr.msk.f32.mxu1 %vm97_vm0, %v55_v10  ;;  %v61_v20 = vld [vmem:[%s1826_s0 + $0x140] sm:$0xff]  ;;  %v28_v21 = vld [vmem:[%s1826_s0 + $0x38] sm:$0xff] }
   0x8   :  { %v29_v22 = vld [vmem:[%s1826_s0 + $0x40] sm:$0xff] }
   0x9   :  { %1242 = vmatpush3.bf16.msra.mxu0 %v1239_v6  ;;  %1247 = vmatpush3.bf16.msra.mxu1 %v1239_v6 }
   0xa   :  { %1132 = vmatprep.subr.msk.mxu0 %vm290_vm1, %v89_v7  ;;  %1245 = vmatprep.subr.msk.mxu1 %vm290_vm1, %v89_v7 }
   0xd   :  { %1133 = vmatpush3.msk.msra.mxu0 %vm290_vm1, %v89_v7  ;;  %1248 = vmatpush3.msk.msra.mxu1 %vm290_vm1, %v89_v7 }
   0xe   :  { %1135 = vmatmul.mubr.msk.f32.vlgmr.msra.gmra.mrb[0].mxu0 %vm97_vm0, %v22_v8  ;;  %1186 = vmatmul.mubr.msk.f32.vlgmr.msra.gmra.mrb[0].mxu1 %vm97_vm0, %v56_v11 }
   0xf   :  { %1137 = vmatprep.mubr.msk.f32.mxu0 %vm97_vm0, %v23_v9  ;;  %1188 = vmatprep.mubr.msk.f32.mxu1 %vm97_vm0, %v57_v12 }
  0x12   :  { %1138 = vmatmul.mubr.msk.f32.gmra.mrb[2].mxu0 %vm97_vm0, %v24_v13  ;;  %1189 = vmatmul.mubr.msk.f32.gmra.mrb[2].mxu1 %vm97_vm0, %v58_v15 }
  0x13   :  { %1140 = vmatprep.mubr.msk.f32.mxu0 %vm97_vm0, %v25_v14  ;;  %1191 = vmatprep.mubr.msk.f32.mxu1 %vm97_vm0, %v59_v16 }
  0x16   :  { %1141 = vmatmul.mubr.msk.f32.gmra.mrb[4].mxu0 %vm97_vm0, %v26_v17  ;;  %1192 = vmatmul.mubr.msk.f32.gmra.mrb[4].mxu1 %vm97_vm0, %v60_v19 }
  0x17   :  { %1143 = vmatprep.mubr.msk.f32.mxu0 %vm97_vm0, %v27_v18 }
  0x18   :  { %10 = vsyncpa [#allocation3], 0  ;;  %1194 = vmatprep.mubr.msk.f32.mxu1 %vm97_vm0, %v61_v20  ;;  %v62_v23 = vld [vmem:[%s1826_s0 + $0x148] sm:$0xff]  ;;  %v63_v24 = vld [vmem:[%s1826_s0 + $0x150] sm:$0xff]  ;;  %v1276_v8 = vmov 0.0   ;;  %vm743_vm2 = vcmask 64512  }
  0x19   :  { %v30_v25 = vld [vmem:[%s1826_s0 + $0x48] sm:$0xff]  ;;  %v31_v26 = vld [vmem:[%s1826_s0 + $0x50] sm:$0xff]  ;;  %v64_v27 = vld [vmem:[%s1826_s0 + $0x158] sm:$0xff]  ;;  %1230 = vmatprep.subr.mxu1 %v1276_v8  ;;  %vm1277_vm3 = vmmov 0   ;;  %vm895_vm4 = vcmask 1041409   ;;  %vm969_vm5 = vcmask 74752  }
  0x1a   :  { %1144 = vmatmul.mubr.msk.f32.gmra.mrb[6].mxu0 %vm97_vm0, %v28_v21  ;;  %1195 = vmatmul.mubr.msk.f32.gmra.mrb[6].mxu1 %vm97_vm0, %v62_v23  ;;  %v65_v28 = vld [vmem:[%s1826_s0 + $0x160] sm:$0xff]  ;;  %v32_v29 = vld [vmem:[%s1826_s0 + $0x58] sm:$0xff]  ;;  %v66_v31 = vld [vmem:[%s1826_s0 + $0x168] sm:$0xff] }
  0x1b   :  { %1146 = vmatprep.mubr.msk.f32.mxu0 %vm97_vm0, %v29_v22  ;;  %1197 = vmatprep.mubr.msk.f32.mxu1 %vm97_vm0, %v63_v24  ;;  %v33_v30 = vld [vmem:[%s1826_s0 + $0x60] sm:$0xff]  ;;  %v67_v32 = vld [vmem:[%s1826_s0 + $0x170] sm:$0xff]  ;;  %v34_v33 = vld [vmem:[%s1826_s0 + $0x68] sm:$0xff] }
  0x1c   :  { %v35_v34 = vld [vmem:[%s1826_s0 + $0x70] sm:$0xff]  ;;  %v68_v35 = vld [vmem:[%s1826_s0 + $0x178] sm:$0xff]  ;;  %v69_v36 = vld [vmem:[%s1826_s0 + $0x180] sm:$0xff] }
  0x1d   :  { %v36_v37 = vld [vmem:[%s1826_s0 + $0x78] sm:$0xff]  ;;  %v37_v38 = vld [vmem:[%s1826_s0 + $0x80] sm:$0xff]  ;;  %v70_v39 = vld [vmem:[%s1826_s0 + $0x188] sm:$0xff] }
  0x1e   :  { %1147 = vmatmul.mubr.msk.f32.gmra.mrb[8].mxu0 %vm97_vm0, %v30_v25  ;;  %1198 = vmatmul.mubr.msk.f32.gmra.mrb[8].mxu1 %vm97_vm0, %v64_v27  ;;  %v71_v40 = vld [vmem:[%s1826_s0 + $0x190] sm:$0xff]  ;;  %v38_v41 = vld [vmem:[%s1826_s0 + $0x88] sm:$0xff]  ;;  %v72_v43 = vld [vmem:[%s1826_s0 + $0x198] sm:$0xff] }
  0x1f   :  { %1149 = vmatprep.mubr.msk.f32.mxu0 %vm97_vm0, %v31_v26  ;;  %1200 = vmatprep.mubr.msk.f32.mxu1 %vm97_vm0, %v65_v28  ;;  %v39_v42 = vld [vmem:[%s1826_s0 + $0x90] sm:$0xff]  ;;  %v73_v44 = vld [vmem:[%s1826_s0 + $0x1a0] sm:$0xff]  ;;  %v40_v45 = vld [vmem:[%s1826_s0 + $0x98] sm:$0xff] }
  0x20   :  { %v41_v46 = vld [vmem:[%s1826_s0 + $0xa0] sm:$0xff]  ;;  %v74_v47 = vld [vmem:[%s1826_s0 + $0x1a8] sm:$0xff]  ;;  %v75_v48 = vld [vmem:[%s1826_s0 + $0x1b0] sm:$0xff] }
  0x21   :  { %v42_v49 = vld [vmem:[%s1826_s0 + $0xa8] sm:$0xff]  ;;  %v43_v50 = vld [vmem:[%s1826_s0 + $0xb0] sm:$0xff]  ;;  %v76_v51 = vld [vmem:[%s1826_s0 + $0x1b8] sm:$0xff] }
  0x22   :  { %1150 = vmatmul.mubr.msk.f32.gmra.mrb[10].mxu0 %vm97_vm0, %v32_v29  ;;  %1201 = vmatmul.mubr.msk.f32.gmra.mrb[10].mxu1 %vm97_vm0, %v66_v31  ;;  %v77_v52 = vld [vmem:[%s1826_s0 + $0x1c0] sm:$0xff]  ;;  %v44_v53 = vld [vmem:[%s1826_s0 + $0xb8] sm:$0xff]  ;;  %v78_v55 = vld [vmem:[%s1826_s0 + $0x1c8] sm:$0xff] }
  0x23   :  { %1152 = vmatprep.mubr.msk.f32.mxu0 %vm97_vm0, %v33_v30  ;;  %1203 = vmatprep.mubr.msk.f32.mxu1 %vm97_vm0, %v67_v32  ;;  %v45_v54 = vld [vmem:[%s1826_s0 + $0xc0] sm:$0xff]  ;;  %v79_v56 = vld [vmem:[%s1826_s0 + $0x1d0] sm:$0xff]  ;;  %v46_v57 = vld [vmem:[%s1826_s0 + $0xc8] sm:$0xff] }
  0x24   :  { %v47_v58 = vld [vmem:[%s1826_s0 + $0xd0] sm:$0xff]  ;;  %v80_v59 = vld [vmem:[%s1826_s0 + $0x1d8] sm:$0xff]  ;;  %v81_v60 = vld [vmem:[%s1826_s0 + $0x1e0] sm:$0xff] }
  0x25   :  { %v48_v61 = vld [vmem:[%s1826_s0 + $0xd8] sm:$0xff]  ;;  %v49_v62 = vld [vmem:[%s1826_s0 + $0xe0] sm:$0xff]  ;;  %v82_v63 = vld [vmem:[%s1826_s0 + $0x1e8] sm:$0xff] }
  0x26   :  { %1153 = vmatmul.mubr.msk.f32.gmra.mrb[12].mxu0 %vm97_vm0, %v34_v33  ;;  %1204 = vmatmul.mubr.msk.f32.gmra.mrb[12].mxu1 %vm97_vm0, %v68_v35  ;;  %v83_v0 = vld [vmem:[%s1826_s0 + $0x1f0] sm:$0xff]  ;;  %v50_v1 = vld [vmem:[%s1826_s0 + $0xe8] sm:$0xff]  ;;  %v84_v3 = vld [vmem:[%s1826_s0 + $0x1f8] sm:$0xff] }
  0x27   :  { %1155 = vmatprep.mubr.msk.f32.mxu0 %vm97_vm0, %v35_v34  ;;  %1206 = vmatprep.mubr.msk.f32.mxu1 %vm97_vm0, %v69_v36  ;;  %v51_v2 = vld [vmem:[%s1826_s0 + $0xf0] sm:$0xff]  ;;  %v52_v4 = vld [vmem:[%s1826_s0 + $0xf8] sm:$0xff]  ;;  %v53_v5 = vld [vmem:[%s1826_s0 + $0x100] sm:$0xff] }
  0x28   :  { %v54_v6 = vld [vmem:[%s1826_s0 + $0x108] sm:$0xff]  ;;  %v885_v7 = vld [vmem:[%s1829_s3] sm:$0xff]  ;;  %s1278_s3 = smov [#allocation2]  }
  0x29   :  { %1231 = vmatpush3.msra.mxu1 %v885_v7  ;;  %v1586_v9 = vld [vmem:[%s1828_s2] ss:$0 sm:$0xff]  ;;  %s977_s30 = sshll.u32 %s1278_s3, 4  ;;  %s978_s30 = int_to_ptr.vmem [resolvable:$true] %s977_s30 }
  0x2a   :  { %1156 = vmatmul.mubr.msk.f32.gmra.mrb[14].mxu0 %vm97_vm0, %v36_v37  ;;  %1207 = vmatmul.mubr.msk.f32.gmra.mrb[14].mxu1 %vm97_vm0, %v70_v39  ;;  %s1252_s6 = scalar_lea.vmem %s978_s30, 32  ;;  %p1257_p1 = scmp.lt.s32.totalorder %s978_s30, %s978_s30 }
  0x2b   :  { %1158 = vmatprep.mubr.msk.f32.mxu0 %vm97_vm0, %v37_v38  ;;  %1209 = vmatprep.mubr.msk.f32.mxu1 %vm97_vm0, %v71_v40  ;;  %p1253_p0 = scmp.ne.s32.totalorder %s978_s30, %s1252_s6  ;;  %p1258_p2 = scmp.lt.s32.totalorder %s1252_s6, %s1252_s6 }
  0x2d   :  { %p1259_p3 = por %p1258_p2, %p1257_p1 }
  0x2e   :  { %1159 = vmatmul.mubr.msk.f32.gmra.mrb[16].mxu0 %vm97_vm0, %v38_v41  ;;  %1210 = vmatmul.mubr.msk.f32.gmra.mrb[16].mxu1 %vm97_vm0, %v72_v43 }
  0x2f   :  { %1161 = vmatprep.mubr.msk.f32.mxu0 %vm97_vm0, %v39_v42  ;;  %1212 = vmatprep.mubr.msk.f32.mxu1 %vm97_vm0, %v73_v44  ;;  %p1260_p4 = pnand %p1259_p3, %p1253_p0 }
  0x32   :  { %1162 = vmatmul.mubr.msk.f32.gmra.mrb[18].mxu0 %vm97_vm0, %v40_v45  ;;  %1213 = vmatmul.mubr.msk.f32.gmra.mrb[18].mxu1 %vm97_vm0, %v74_v47 }
  0x33   :  { %1164 = vmatprep.mubr.msk.f32.mxu0 %vm97_vm0, %v41_v46  ;;  %1215 = vmatprep.mubr.msk.f32.mxu1 %vm97_vm0, %v75_v48 }
  0x36   :  { %1165 = vmatmul.mubr.msk.f32.gmra.mrb[20].mxu0 %vm97_vm0, %v42_v49  ;;  %1216 = vmatmul.mubr.msk.f32.gmra.mrb[20].mxu1 %vm97_vm0, %v76_v51 }
  0x37   :  { %1167 = vmatprep.mubr.msk.f32.mxu0 %vm97_vm0, %v43_v50  ;;  %1218 = vmatprep.mubr.msk.f32.mxu1 %vm97_vm0, %v77_v52 }
  0x3a   :  { %1168 = vmatmul.mubr.msk.f32.gmra.mrb[22].mxu0 %vm97_vm0, %v44_v53  ;;  %1219 = vmatmul.mubr.msk.f32.gmra.mrb[22].mxu1 %vm97_vm0, %v78_v55 }
  0x3b   :  { %1170 = vmatprep.mubr.msk.f32.mxu0 %vm97_vm0, %v45_v54  ;;  %1221 = vmatprep.mubr.msk.f32.mxu1 %vm97_vm0, %v79_v56 }
  0x3e   :  { %1171 = vmatmul.mubr.msk.f32.gmra.mrb[24].mxu0 %vm97_vm0, %v46_v57  ;;  %1222 = vmatmul.mubr.msk.f32.gmra.mrb[24].mxu1 %vm97_vm0, %v80_v59 }
  0x3f   :  { %1173 = vmatprep.mubr.msk.f32.mxu0 %vm97_vm0, %v47_v58  ;;  %1224 = vmatprep.mubr.msk.f32.mxu1 %vm97_vm0, %v81_v60 }
  0x42   :  { %1174 = vmatmul.mubr.msk.f32.gmra.mrb[26].mxu0 %vm97_vm0, %v48_v61  ;;  %1225 = vmatmul.mubr.msk.f32.gmra.mrb[26].mxu1 %vm97_vm0, %v82_v63 }
  0x43   :  { %1176 = vmatprep.mubr.msk.f32.mxu0 %vm97_vm0, %v49_v62  ;;  %1227 = vmatprep.mubr.msk.f32.mxu1 %vm97_vm0, %v83_v0 }
  0x46   :  { %1177 = vmatmul.mubr.msk.f32.gmra.mrb[28].mxu0 %vm97_vm0, %v50_v1  ;;  %1228 = vmatmul.mubr.msk.f32.gmra.mrb[28].mxu1 %vm97_vm0, %v84_v3 }
  0x47   :  { %1179 = vmatprep.mubr.msk.f32.mxu0 %vm97_vm0, %v51_v2  ;;  %1232 = vmatprep.mubr.msk.f32.mxu1 %vm1277_vm3, %v1276_v8 }
  0x4a   :  { %1180 = vmatmul.mubr.msk.f32.gmra.mrb[30].mxu0 %vm97_vm0, %v52_v4 }
  0x4b   :  { %1182 = vmatprep.mubr.msk.f32.mxu0 %vm97_vm0, %v53_v5 }
  0x4e   :  { %1183 = vmatmul.mubr.msk.f32.gmra.mrb[32].mxu0 %vm97_vm0, %v54_v6 }
  0xe1   :  { %v1136_v10 = vpop.f32.mrb[0].mxu0  ;;  %v1590_v14 = vpop.f32.mrb[0].mxu1 }
  0xe2   :  { %v366_v11 = vadd.f32 %v1136_v10, %v1586_v9  ;;  %v360_v12 = vpop.f32.mrb[1].mxu0  ;;  %v1592_v16 = vpop.f32.mrb[1].mxu1 }
  0xe3   :  { %v361_v13 = vadd.f32 %v1586_v9, %v360_v12 }
  0xe4   :  { %v680_v15 = vmax.f32 %v366_v11, 0.0 }
  0xe5   :  { %v679_v17 = vmax.f32 %v361_v13, 0.0  ;;  %v1139_v18 = vpop.f32.mrb[2].mxu0  ;;  %v1598_v24 = vpop.f32.mrb[2].mxu1 }
  0xe6   :  { %v745_v19 = vsel %vm743_vm2, %v680_v15, 0.0  ;;  %v376_v20 = vadd.f32 %v1139_v18, %v1586_v9  ;;  %v370_v21 = vpop.f32.mrb[3].mxu0  ;;  %v1600_v26 = vpop.f32.mrb[3].mxu1 }
  0xe7   :  { %v744_v22 = vsel %vm743_vm2, %v679_v17, 0.0  ;;  %v371_v23 = vadd.f32 %v1586_v9, %v370_v21 }
  0xe8   :  { %v746_v25 = vadd.f32 %v745_v19, %v744_v22  ;;  %v682_v27 = vmax.f32 %v376_v20, 0.0 }
  0xe9   :  { %v681_v28 = vmax.f32 %v371_v23, 0.0  ;;  %v1142_v29 = vpop.f32.mrb[4].mxu0  ;;  %v1605_v34 = vpop.f32.mrb[4].mxu1 }
  0xea   :  { %v386_v30 = vadd.f32 %v1142_v29, %v1586_v9  ;;  %v380_v31 = vpop.f32.mrb[5].mxu0  ;;  %v1607_v36 = vpop.f32.mrb[5].mxu1  ;;  %v749_v37 = vsel %vm743_vm2, %v682_v27, 0.0 }
  0xeb   :  { %v747_v32 = vsel %vm743_vm2, %v681_v28, 0.0  ;;  %v381_v33 = vadd.f32 %v1586_v9, %v380_v31 }
  0xec   :  { %v748_v35 = vadd.f32 %v747_v32, %v746_v25  ;;  %v684_v38 = vmax.f32 %v386_v30, 0.0 }
  0xed   :  { %v683_v39 = vmax.f32 %v381_v33, 0.0  ;;  %v1145_v40 = vpop.f32.mrb[6].mxu0  ;;  %v1613_v46 = vpop.f32.mrb[6].mxu1 }
  0xee   :  { %v750_v41 = vadd.f32 %v749_v37, %v748_v35  ;;  %v396_v42 = vadd.f32 %v1145_v40, %v1586_v9  ;;  %v390_v43 = vpop.f32.mrb[7].mxu0  ;;  %v1615_v48 = vpop.f32.mrb[7].mxu1  ;;  %v753_v49 = vsel %vm743_vm2, %v684_v38, 0.0 }
  0xef   :  { %v751_v44 = vsel %vm743_vm2, %v683_v39, 0.0  ;;  %v391_v45 = vadd.f32 %v1586_v9, %v390_v43 }
  0xf0   :  { %v752_v47 = vadd.f32 %v751_v44, %v750_v41  ;;  %v686_v50 = vmax.f32 %v396_v42, 0.0 }
  0xf1   :  { %v685_v51 = vmax.f32 %v391_v45, 0.0  ;;  %v1148_v52 = vpop.f32.mrb[8].mxu0  ;;  %v1621_v58 = vpop.f32.mrb[8].mxu1 }
  0xf2   :  { %v754_v53 = vadd.f32 %v753_v49, %v752_v47  ;;  %v406_v54 = vadd.f32 %v1148_v52, %v1586_v9  ;;  %v400_v55 = vpop.f32.mrb[9].mxu0  ;;  %v1623_v60 = vpop.f32.mrb[9].mxu1  ;;  %v757_v61 = vsel %vm743_vm2, %v686_v50, 0.0 }
  0xf3   :  { %v755_v56 = vsel %vm743_vm2, %v685_v51, 0.0  ;;  %v401_v57 = vadd.f32 %v1586_v9, %v400_v55 }
  0xf4   :  { %v756_v59 = vadd.f32 %v755_v56, %v754_v53  ;;  %v688_v62 = vmax.f32 %v406_v54, 0.0 }
  0xf5   :  { %v687_v63 = vmax.f32 %v401_v57, 0.0  ;;  %v1151_v0 = vpop.f32.mrb[10].mxu0  ;;  %v1629_v6 = vpop.f32.mrb[10].mxu1 }
  0xf6   :  { %v758_v1 = vadd.f32 %v757_v61, %v756_v59  ;;  %v416_v2 = vadd.f32 %v1151_v0, %v1586_v9  ;;  %v410_v3 = vpop.f32.mrb[11].mxu0  ;;  %v1631_v10 = vpop.f32.mrb[11].mxu1  ;;  %v761_v8 = vsel %vm743_vm2, %v688_v62, 0.0 }
  0xf7   :  { %v759_v4 = vsel %vm743_vm2, %v687_v63, 0.0  ;;  %v411_v5 = vadd.f32 %v1586_v9, %v410_v3 }
  0xf8   :  { %v760_v7 = vadd.f32 %v759_v4, %v758_v1  ;;  %v690_v11 = vmax.f32 %v416_v2, 0.0 }
  0xf9   :  { %v689_v12 = vmax.f32 %v411_v5, 0.0  ;;  %v1154_v13 = vpop.f32.mrb[12].mxu0  ;;  %v1637_v21 = vpop.f32.mrb[12].mxu1 }
  0xfa   :  { %v762_v15 = vadd.f32 %v761_v8, %v760_v7  ;;  %v426_v17 = vadd.f32 %v1154_v13, %v1586_v9  ;;  %v420_v18 = vpop.f32.mrb[13].mxu0  ;;  %v1639_v23 = vpop.f32.mrb[13].mxu1  ;;  %v765_v25 = vsel %vm743_vm2, %v690_v11, 0.0 }
  0xfb   :  { %v763_v19 = vsel %vm743_vm2, %v689_v12, 0.0  ;;  %v421_v20 = vadd.f32 %v1586_v9, %v420_v18 }
  0xfc   :  { %v764_v22 = vadd.f32 %v763_v19, %v762_v15  ;;  %v692_v27 = vmax.f32 %v426_v17, 0.0 }
  0xfd   :  { %v691_v28 = vmax.f32 %v421_v20, 0.0  ;;  %v1157_v29 = vpop.f32.mrb[14].mxu0  ;;  %v1645_v37 = vpop.f32.mrb[14].mxu1 }
  0xfe   :  { %v766_v30 = vadd.f32 %v765_v25, %v764_v22  ;;  %v436_v31 = vadd.f32 %v1157_v29, %v1586_v9  ;;  %v430_v32 = vpop.f32.mrb[15].mxu0  ;;  %v1647_v39 = vpop.f32.mrb[15].mxu1  ;;  %v769_v40 = vsel %vm743_vm2, %v692_v27, 0.0 }
  0xff   :  { %v767_v33 = vsel %vm743_vm2, %v691_v28, 0.0  ;;  %v431_v35 = vadd.f32 %v1586_v9, %v430_v32 }
 0x100   :  { %v768_v38 = vadd.f32 %v767_v33, %v766_v30  ;;  %v694_v41 = vmax.f32 %v436_v31, 0.0 }
 0x101   :  { %v693_v42 = vmax.f32 %v431_v35, 0.0  ;;  %v1160_v43 = vpop.f32.mrb[16].mxu0  ;;  %v1653_v51 = vpop.f32.mrb[16].mxu1 }
 0x102   :  { %v770_v44 = vadd.f32 %v769_v40, %v768_v38  ;;  %v446_v45 = vadd.f32 %v1160_v43, %v1586_v9  ;;  %v440_v47 = vpop.f32.mrb[17].mxu0  ;;  %v1655_v53 = vpop.f32.mrb[17].mxu1  ;;  %v773_v54 = vsel %vm743_vm2, %v694_v41, 0.0 }
 0x103   :  { %v771_v49 = vsel %vm743_vm2, %v693_v42, 0.0  ;;  %v441_v50 = vadd.f32 %v1586_v9, %v440_v47 }
 0x104   :  { %v772_v52 = vadd.f32 %v771_v49, %v770_v44  ;;  %v696_v55 = vmax.f32 %v446_v45, 0.0 }
 0x105   :  { %v695_v56 = vmax.f32 %v441_v50, 0.0  ;;  %v1163_v57 = vpop.f32.mrb[18].mxu0  ;;  %v1661_v1 = vpop.f32.mrb[18].mxu1 }
 0x106   :  { %v774_v59 = vadd.f32 %v773_v54, %v772_v52  ;;  %v456_v61 = vadd.f32 %v1163_v57, %v1586_v9  ;;  %v450_v62 = vpop.f32.mrb[19].mxu0  ;;  %v1663_v3 = vpop.f32.mrb[19].mxu1  ;;  %v777_v4 = vsel %vm743_vm2, %v696_v55, 0.0 }
 0x107   :  { %v775_v63 = vsel %vm743_vm2, %v695_v56, 0.0  ;;  %v451_v0 = vadd.f32 %v1586_v9, %v450_v62 }
 0x108   :  { %v776_v2 = vadd.f32 %v775_v63, %v774_v59  ;;  %v698_v5 = vmax.f32 %v456_v61, 0.0 }
 0x109   :  { %v697_v7 = vmax.f32 %v451_v0, 0.0  ;;  %v1166_v8 = vpop.f32.mrb[20].mxu0  ;;  %v1669_v18 = vpop.f32.mrb[20].mxu1 }
 0x10a   :  { %v778_v11 = vadd.f32 %v777_v4, %v776_v2  ;;  %v466_v12 = vadd.f32 %v1166_v8, %v1586_v9  ;;  %v460_v13 = vpop.f32.mrb[21].mxu0  ;;  %v1671_v20 = vpop.f32.mrb[21].mxu1  ;;  %v781_v22 = vsel %vm743_vm2, %v698_v5, 0.0 }
 0x10b   :  { %v779_v15 = vsel %vm743_vm2, %v697_v7, 0.0  ;;  %v461_v17 = vadd.f32 %v1586_v9, %v460_v13 }
 0x10c   :  { %v780_v19 = vadd.f32 %v779_v15, %v778_v11  ;;  %v700_v25 = vmax.f32 %v466_v12, 0.0 }
 0x10d   :  { %v699_v27 = vmax.f32 %v461_v17, 0.0  ;;  %v1169_v28 = vpop.f32.mrb[22].mxu0  ;;  %v1677_v35 = vpop.f32.mrb[22].mxu1 }
 0x10e   :  { %v782_v29 = vadd.f32 %v781_v22, %v780_v19  ;;  %v476_v30 = vadd.f32 %v1169_v28, %v1586_v9  ;;  %v470_v31 = vpop.f32.mrb[23].mxu0  ;;  %v1679_v40 = vpop.f32.mrb[23].mxu1  ;;  %v785_v41 = vsel %vm743_vm2, %v700_v25, 0.0 }
 0x10f   :  { %v783_v32 = vsel %vm743_vm2, %v699_v27, 0.0  ;;  %v471_v33 = vadd.f32 %v1586_v9, %v470_v31 }
 0x110   :  { %v784_v38 = vadd.f32 %v783_v32, %v782_v29  ;;  %v702_v42 = vmax.f32 %v476_v30, 0.0 }
 0x111   :  { %v701_v43 = vmax.f32 %v471_v33, 0.0  ;;  %v1172_v44 = vpop.f32.mrb[24].mxu0  ;;  %v1685_v54 = vpop.f32.mrb[24].mxu1 }
 0x112   :  { %v786_v45 = vadd.f32 %v785_v41, %v784_v38  ;;  %v486_v47 = vadd.f32 %v1172_v44, %v1586_v9  ;;  %v480_v49 = vpop.f32.mrb[25].mxu0  ;;  %v1687_v56 = vpop.f32.mrb[25].mxu1  ;;  %v789_v57 = vsel %vm743_vm2, %v702_v42, 0.0 }
 0x113   :  { %v787_v50 = vsel %vm743_vm2, %v701_v43, 0.0  ;;  %v481_v52 = vadd.f32 %v1586_v9, %v480_v49  ;;  %v531_v49 = vadd.f32 %v1586_v9, %v1592_v16  ;;  %v541_v16 = vadd.f32 %v1586_v9, %v1600_v26 }
 0x114   :  { %v788_v55 = vadd.f32 %v787_v50, %v786_v45  ;;  %v704_v59 = vmax.f32 %v486_v47, 0.0  ;;  %v551_v26 = vadd.f32 %v1586_v9, %v1607_v36  ;;  %v566_v36 = vadd.f32 %v1613_v46, %v1586_v9 }
 0x115   :  { %v703_v61 = vmax.f32 %v481_v52, 0.0  ;;  %v1175_v62 = vpop.f32.mrb[26].mxu0  ;;  %v1693_v7 = vpop.f32.mrb[26].mxu1  ;;  %v581_v46 = vadd.f32 %v1586_v9, %v1631_v10  ;;  %v596_v10 = vadd.f32 %v1637_v21, %v1586_v9  ;;  %v611_v21 = vadd.f32 %v1586_v9, %v1655_v53 }
 0x116   :  { %v790_v63 = vadd.f32 %v789_v57, %v788_v55  ;;  %v496_v0 = vadd.f32 %v1175_v62, %v1586_v9  ;;  %v490_v2 = vpop.f32.mrb[27].mxu0  ;;  %v1695_v11 = vpop.f32.mrb[27].mxu1  ;;  %v793_v12 = vsel %vm743_vm2, %v704_v59, 0.0  ;;  %v626_v53 = vadd.f32 %v1661_v1, %v1586_v9 }
 0x117   :  { %v791_v4 = vsel %vm743_vm2, %v703_v61, 0.0  ;;  %v491_v5 = vadd.f32 %v1586_v9, %v490_v2  ;;  %v641_v1 = vadd.f32 %v1586_v9, %v1679_v40  ;;  %v656_v40 = vadd.f32 %v1685_v54, %v1586_v9 }
 0x118   :  { %v792_v8 = vadd.f32 %v791_v4, %v790_v63  ;;  %v706_v13 = vmax.f32 %v496_v0, 0.0  ;;  %v536_v0 = vadd.f32 %v1590_v14, %v1586_v9  ;;  %v546_v14 = vadd.f32 %v1598_v24, %v1586_v9 }
 0x119   :  { %v705_v15 = vmax.f32 %v491_v5, 0.0  ;;  %v1178_v17 = vpop.f32.mrb[28].mxu0  ;;  %v1701_v29 = vpop.f32.mrb[28].mxu1  ;;  %v713_v5 = vmax.f32 %v531_v49, 0.0  ;;  %v561_v24 = vadd.f32 %v1586_v9, %v1615_v48 }
 0x11a   :  { %v794_v19 = vadd.f32 %v793_v12, %v792_v8  ;;  %v506_v22 = vadd.f32 %v1178_v17, %v1586_v9  ;;  %v500_v25 = vpop.f32.mrb[29].mxu0  ;;  %v1703_v31 = vpop.f32.mrb[29].mxu1  ;;  %v797_v32 = vsel %vm743_vm2, %v706_v13, 0.0 }
 0x11b   :  { %v795_v27 = vsel %vm743_vm2, %v705_v15, 0.0  ;;  %v501_v28 = vadd.f32 %v1586_v9, %v500_v25  ;;  %v671_v54 = vadd.f32 %v1586_v9, %v1703_v31 }
 0x11c   :  { %v796_v30 = vadd.f32 %v795_v27, %v794_v19  ;;  %v708_v33 = vmax.f32 %v506_v22, 0.0  ;;  %v714_v22 = vmax.f32 %v536_v0, 0.0  ;;  %v816_v27 = vsel %vm743_vm2, %v713_v5, 0.0 }
 0x11d   :  { %v707_v38 = vmax.f32 %v501_v28, 0.0  ;;  %v1181_v41 = vpop.f32.mrb[30].mxu0  ;;  %v715_v28 = vmax.f32 %v541_v16, 0.0 }
 0x11e   :  { %v798_v42 = vadd.f32 %v797_v32, %v796_v30  ;;  %v516_v43 = vadd.f32 %v1181_v41, %v1586_v9  ;;  %v510_v44 = vpop.f32.mrb[31].mxu0  ;;  %v801_v52 = vsel %vm743_vm2, %v708_v33, 0.0  ;;  %v818_v32 = vsel %vm743_vm2, %v714_v22, 0.0 }
 0x11f   :  { %v799_v45 = vsel %vm743_vm2, %v707_v38, 0.0  ;;  %v511_v47 = vadd.f32 %v1586_v9, %v510_v44  ;;  %v556_v38 = vadd.f32 %v1605_v34, %v1586_v9  ;;  %v716_v41 = vmax.f32 %v546_v14, 0.0 }
 0x120   :  { %v800_v50 = vadd.f32 %v799_v45, %v798_v42  ;;  %v710_v55 = vmax.f32 %v516_v43, 0.0  ;;  %v820_v42 = vsel %vm743_vm2, %v715_v28, 0.0  ;;  %v717_v43 = vmax.f32 %v551_v26, 0.0 }
 0x121   :  { %v709_v57 = vmax.f32 %v511_v47, 0.0  ;;  %v1184_v59 = vpop.f32.mrb[32].mxu0  ;;  %v718_v47 = vmax.f32 %v556_v38, 0.0  ;;  %v822_v49 = vsel %vm743_vm2, %v716_v41, 0.0  ;;  %v571_v34 = vadd.f32 %v1586_v9, %v1623_v60 }
 0x122   :  { %v802_v61 = vadd.f32 %v801_v52, %v800_v50  ;;  %v526_v62 = vadd.f32 %v1184_v59, %v1586_v9  ;;  %v520_v63 = vpop.f32.mrb[33].mxu0  ;;  %v805_v13 = vsel %vm743_vm2, %v710_v55, 0.0  ;;  %v824_v50 = vsel %vm743_vm2, %v717_v43, 0.0 }
 0x123   :  { %v803_v2 = vsel %vm743_vm2, %v709_v57, 0.0  ;;  %v521_v4 = vadd.f32 %v1586_v9, %v520_v63  ;;  %v719_v52 = vmax.f32 %v561_v24, 0.0  ;;  %v826_v57 = vsel %vm743_vm2, %v718_v47, 0.0 }
 0x124   :  { %v804_v8 = vadd.f32 %v803_v2, %v802_v61  ;;  %v712_v12 = vmax.f32 %v526_v62, 0.0  ;;  %v720_v61 = vmax.f32 %v566_v36, 0.0  ;;  %v576_v62 = vadd.f32 %v1621_v58, %v1586_v9 }
 0x125   :  { %v711_v15 = vmax.f32 %v521_v4, 0.0  ;;  %v828_v48 = vsel %vm743_vm2, %v719_v52, 0.0  ;;  %v721_v63 = vmax.f32 %v571_v34, 0.0  ;;  %v586_v60 = vadd.f32 %v1629_v6, %v1586_v9 }
 0x126   :  { %v1720_v17 = vadd.f32 %v805_v13, %v804_v8  ;;  %v814_v19 = vsel %vm743_vm2, %v712_v12, 0.0  ;;  %v830_v2 = vsel %vm743_vm2, %v720_v61, 0.0  ;;  %v722_v5 = vmax.f32 %v576_v62, 0.0 }
 0x127   :  { %v813_v25 = vsel %vm743_vm2, %v711_v15, 0.0  ;;  %v832_v16 = vsel %vm743_vm2, %v721_v63, 0.0  ;;  %v723_v8 = vmax.f32 %v581_v46, 0.0  ;;  %v591_v12 = vadd.f32 %v1586_v9, %v1639_v23 }
 0x128   :  { %v815_v30 = vadd.f32 %v814_v19, %v813_v25  ;;  %v724_v15 = vmax.f32 %v586_v60, 0.0  ;;  %v834_v19 = vsel %vm743_vm2, %v722_v5, 0.0  ;;  %v601_v6 = vadd.f32 %v1586_v9, %v1647_v39 }
 0x129   :  { %v836_v22 = vsel %vm743_vm2, %v723_v8, 0.0  ;;  %v725_v14 = vmax.f32 %v591_v12, 0.0  ;;  %v726_v26 = vmax.f32 %v596_v10, 0.0  ;;  %v616_v39 = vadd.f32 %v1653_v51, %v1586_v9 }
 0x12a   :  { %v817_v33 = vadd.f32 %v816_v27, %v815_v30  ;;  %v838_v27 = vsel %vm743_vm2, %v724_v15, 0.0  ;;  %v606_v30 = vadd.f32 %v1645_v37, %v1586_v9  ;;  %v729_v24 = vmax.f32 %v611_v21, 0.0 }
 0x12b   :  { %v840_v23 = vsel %vm743_vm2, %v725_v14, 0.0  ;;  %v842_v38 = vsel %vm743_vm2, %v726_v26, 0.0  ;;  %v730_v47 = vmax.f32 %v616_v39, 0.0  ;;  %v631_v51 = vadd.f32 %v1586_v9, %v1671_v20 }
 0x12c   :  { %v819_v44 = vadd.f32 %v818_v32, %v817_v33  ;;  %v727_v32 = vmax.f32 %v601_v6, 0.0  ;;  %v646_v20 = vadd.f32 %v1677_v35, %v1586_v9  ;;  %v661_v35 = vadd.f32 %v1586_v9, %v1695_v11 }
 0x12d   :  { %v850_v34 = vsel %vm743_vm2, %v730_v47, 0.0  ;;  %v733_v61 = vmax.f32 %v631_v51, 0.0  ;;  %v738_v10 = vmax.f32 %v656_v40, 0.0  ;;  %v807_v6 = vrot.slane %v1720_v17, 4  ;;  %v1051_v51 = vld [vmem:[%s1830_s4] ss:$0 sm:$0xff] }
 0x12e   :  { %v821_v45 = vadd.f32 %v820_v42, %v819_v44  ;;  %v728_v42 = vmax.f32 %v606_v30, 0.0  ;;  %v844_v43 = vsel %vm743_vm2, %v727_v32, 0.0  ;;  %v621_v44 = vadd.f32 %v1586_v9, %v1663_v3 }
 0x12f   :  { %v736_v5 = vmax.f32 %v646_v20, 0.0  ;;  %v676_v26 = vadd.f32 %v1701_v29, %v1586_v9 }
 0x130   :  { %v823_v55 = vadd.f32 %v822_v49, %v821_v45  ;;  %v846_v36 = vsel %vm743_vm2, %v728_v42, 0.0  ;;  %v848_v49 = vsel %vm743_vm2, %v729_v24, 0.0 }
 0x131   :  { %v742_v31 = vmax.f32 %v676_v26, 0.0 }
 0x132   :  { %v825_v59 = vadd.f32 %v824_v50, %v823_v55  ;;  %v731_v50 = vmax.f32 %v621_v44, 0.0 }
 0x133   :  { %v874_v42 = vsel %vm743_vm2, %v742_v31, 0.0 }
 0x134   :  { %v827_v0 = vadd.f32 %v826_v57, %v825_v59  ;;  %v732_v57 = vmax.f32 %v626_v53, 0.0  ;;  %v852_v3 = vsel %vm743_vm2, %v731_v50, 0.0  ;;  %v636_v59 = vadd.f32 %v1669_v18, %v1586_v9 }
 0x136   :  { %v829_v4 = vadd.f32 %v828_v48, %v827_v0  ;;  %v854_v62 = vsel %vm743_vm2, %v732_v57, 0.0  ;;  %v734_v46 = vmax.f32 %v636_v59, 0.0  ;;  %v856_v0 = vsel %vm743_vm2, %v733_v61, 0.0 }
 0x138   :  { %v831_v13 = vadd.f32 %v830_v2, %v829_v4  ;;  %v735_v2 = vmax.f32 %v641_v1, 0.0  ;;  %v651_v4 = vadd.f32 %v1586_v9, %v1687_v56 }
 0x13a   :  { %v833_v58 = vadd.f32 %v832_v16, %v831_v13  ;;  %v858_v16 = vsel %vm743_vm2, %v734_v46, 0.0  ;;  %v860_v8 = vsel %vm743_vm2, %v735_v2, 0.0  ;;  %v737_v12 = vmax.f32 %v651_v4, 0.0 }
 0x13c   :  { %v835_v25 = vadd.f32 %v834_v19, %v833_v58  ;;  %v862_v58 = vsel %vm743_vm2, %v736_v5, 0.0  ;;  %v864_v56 = vsel %vm743_vm2, %v737_v12, 0.0  ;;  %v666_v19 = vadd.f32 %v1693_v7, %v1586_v9 }
 0x13d   :  { %v808_v7 = vadd.f32 %v807_v6, %v1720_v17 }
 0x13e   :  { %v837_v28 = vadd.f32 %v836_v22, %v835_v25  ;;  %v739_v22 = vmax.f32 %v661_v35, 0.0  ;;  %v866_v25 = vsel %vm743_vm2, %v738_v10, 0.0 }
 0x140   :  { %v839_v33 = vadd.f32 %v838_v27, %v837_v28  ;;  %v740_v27 = vmax.f32 %v666_v19, 0.0  ;;  %v868_v28 = vsel %vm743_vm2, %v739_v22, 0.0 }
 0x142   :  { %v841_v41 = vadd.f32 %v840_v23, %v839_v33  ;;  %v741_v23 = vmax.f32 %v671_v54, 0.0  ;;  %v870_v21 = vsel %vm743_vm2, %v740_v27, 0.0 }
 0x144   :  { %v843_v45 = vadd.f32 %v842_v38, %v841_v41  ;;  %v872_v33 = vsel %vm743_vm2, %v741_v23, 0.0  ;;  %v809_v41 = vrot.slane %v808_v7, 2 }
 0x146   :  { %v845_v37 = vadd.f32 %v844_v43, %v843_v45  ;;  %v810_v24 = vadd.f32 %v809_v41, %v808_v7 }
 0x148   :  { %v847_v52 = vadd.f32 %v846_v36, %v845_v37  ;;  %v811_v9 = vrot.slane %v810_v24, 1 }
 0x14a   :  { %v849_v55 = vadd.f32 %v848_v49, %v847_v52  ;;  %v812_v47 = vadd.f32 %v811_v9, %v810_v24 }
 0x14c   :  { %v851_v48 = vadd.f32 %v850_v34, %v849_v55  ;;  %v883_v36 = vmul.f32 0.00390625, %v812_v47 }
 0x14e   :  { %v853_v63 = vadd.f32 %v852_v3, %v851_v48 }
 0x150   :  { %v855_v60 = vadd.f32 %v854_v62, %v853_v63 }
 0x152   :  { %v857_v18 = vadd.f32 %v856_v0, %v855_v60 }
 0x154   :  { %v859_v13 = vadd.f32 %v858_v16, %v857_v18 }
 0x156   :  { %v861_v15 = vadd.f32 %v860_v8, %v859_v13 }
 0x158   :  { %v863_v14 = vadd.f32 %v862_v58, %v861_v15 }
 0x15a   :  { %v865_v11 = vadd.f32 %v864_v56, %v863_v14 }
 0x15c   :  { %v867_v30 = vadd.f32 %v866_v25, %v865_v11 }
 0x15e   :  { %v869_v32 = vadd.f32 %v868_v28, %v867_v30 }
 0x160   :  { %v871_v38 = vadd.f32 %v870_v21, %v869_v32 }
 0x162   :  { %v873_v39 = vadd.f32 %v872_v33, %v871_v38 }
 0x164   :  { %v875_v43 = vadd.f32 %v874_v42, %v873_v39 }
 0x166   :  { %v876_v44 = vrot.slane %v875_v43, 4 }
 0x168   :  { %v877_v45 = vadd.f32 %v876_v44, %v875_v43 }
 0x16a   :  { %v878_v29 = vrot.slane %v877_v45, 2 }
 0x16c   :  { %v879_v37 = vadd.f32 %v878_v29, %v877_v45 }
 0x16e   :  { %v880_v17 = vrot.slane %v879_v37, 1 }
 0x170   :  { %v881_v53 = vadd.f32 %v880_v17, %v879_v37 }
 0x172   :  { %v884_v49 = vmul.f32 0.00390625, %v881_v53 }
 0x174   :  { %v896_v50 = vsel %vm895_vm4, %v884_v49, %v883_v36 }
 0x175   :  { %1233 = vmatmul.mubr.msk.f32.vlgmr.msra.gmra.mrb[30].mxu1 %vm743_vm2, %v896_v50 }
 0x248   :  { %v965_v52 = vpop.f32.mrb[30].mxu1 }
 0x249   :  { %v966_v34 = vadd.f32 %v1051_v51, %v965_v52  ;;  %v1234_v55 = vpop.f32.mrb[31].mxu1 }
 0x24b   :  { %970 = vst.msk [vmem:[#allocation2] sm:$0x3] %vm969_vm5, %v966_v34 }
 0x24c   :  { %1263 = shalt.err (!%p1260_p4)
}
 0x24d   :  { %s1264_s9 = scalar_lea.hbm %s1831_s5, 32 }
 0x24e   :  { %p1265_p5 = scmp.ne.s32.totalorder %s1831_s5, %s1264_s9  ;;  %p1268_p6 = scmp.lt.u32.totalorder %s1264_s9, %s1831_s5 }
 0x250   :  { %p1270_p7 = pnand %p1268_p6, %p1265_p5 }
 0x252   :  { %1273 = shalt.err (!%p1270_p7)
}
 0x253   :  { %980 = dma.vmem_to_hbm [thread:$0]  %s978_s30, 32, %s1831_s5, [#allocation3]  }
 0x254   :  { %1274 = dma.done.wait [#allocation3], 32  }
 0x255   :  { %1275 = vsyncadd [#allocation3], 4294967264 }
 0x256   :  { %984 = vsyncpa [#allocation3], 1 }

</bundles_post_ra>
